<compile_context>
chip_gen: v7x
topology: tpu7x:2x2x1
jax: 0.10.0
libtpu: 0.0.40
codegen_flags: <defaults>
</compile_context>

<pallas_src>
import functools

import jax
import jax.numpy as jnp
from jax.experimental import pallas as pl
from jax.experimental.pallas import tpu as pltpu


def _round_up(v: int, m: int) -> int:
    return (v + m - 1) // m * m


def _packed_layout(n_in: int, n_hidden: int):
    """Row offsets of each section inside the packed parameter slab.

    Every section starts on an 8-row (sublane-tile) boundary so the static
    slices taken inside the kernel never straddle a (8,128) tile boundary.
    """
    off_w1 = 0
    off_b1 = _round_up(off_w1 + n_in, 8)
    off_w2 = _round_up(off_b1 + 1, 8)
    off_b2 = _round_up(off_w2 + n_hidden, 8)
    total_rows = _round_up(off_b2 + 1, 8)
    return off_b1, off_w2, off_b2, total_rows


def pack_policy_params(w1, b1, w2, b2):
    """One-time layout plumbing — call when params are created/updated, NOT per step.

    w1: [nHidden, nInput], b1: [nHidden], w2: [nOutput, nHidden], b2: [nOutput]
    (PyTorch nn.Linear conventions)  ->  f32 slab [total_rows, nHidden]:
        rows [0, nIn)                  : W1^T
        row  off_b1                    : b1
        rows [off_w2, off_w2 + nHidden): W2^T, zero-padded to nHidden columns
        row  off_b2                    : b2,   zero-padded to nHidden columns
    """
    n_hidden, n_in = w1.shape
    n_out = w2.shape[0]
    off_b1, off_w2, off_b2, total_rows = _packed_layout(n_in, n_hidden)
    buf = jnp.zeros((total_rows, n_hidden), jnp.float32)
    buf = buf.at[0:n_in, :].set(jnp.asarray(w1, jnp.float32).T)
    buf = buf.at[off_b1, :].set(jnp.asarray(b1, jnp.float32))
    buf = buf.at[off_w2:off_w2 + n_hidden, 0:n_out].set(jnp.asarray(w2, jnp.float32).T)
    buf = buf.at[off_b2, 0:n_out].set(jnp.asarray(b2, jnp.float32))
    return buf


def _policy_kernel(x_ref, p_ref, o_ref, *, n_in, n_hidden, n_out,
                   off_b1, off_w2, off_b2):
    # Hot path: fc1 -> relu -> fc2 -> softmax, everything resident in VMEM.
    x = x_ref[...]                                   # [TB, nIn]
    w1 = p_ref[0:n_in, :]                            # [nIn, nH]
    b1 = p_ref[off_b1:off_b1 + 1, :]                 # [1, nH]
    w2 = p_ref[off_w2:off_w2 + n_hidden, :]          # [nH, nH] (cols >= nOut are 0)
    b2 = p_ref[off_b2:off_b2 + 1, :]                 # [1, nH]  (cols >= nOut are 0)

    h = jnp.dot(x, w1, preferred_element_type=jnp.float32) + b1
    h = jnp.maximum(h, 0.0)                          # ReLU
    # Zero-padded W2/b2 columns only affect logit columns >= nOut, which are
    # sliced away before the softmax -> bit-exact vs. the unpadded computation.
    logits = (jnp.dot(h, w2, preferred_element_type=jnp.float32) + b2)[:, :n_out]

    # Numerically-stable softmax over the feature (last) axis == torch dim=1.
    m = jnp.max(logits, axis=-1, keepdims=True)
    e = jnp.exp(logits - m)
    denom = jnp.sum(e, axis=-1, keepdims=True)
    o_ref[...] = (e * pl.reciprocal(denom, approx=False)).astype(o_ref.dtype)


@functools.partial(jax.jit, static_argnames=("n_out", "tile_b"))
def policy_net_forward(x, packed_params, *, n_out, tile_b=128):
    """x: [B, nInput] float32; packed_params: output of pack_policy_params()."""
    B, n_in = x.shape
    n_hidden = packed_params.shape[1]
    off_b1, off_w2, off_b2, total_rows = _packed_layout(n_in, n_hidden)
    assert packed_params.shape[0] == total_rows, "params must come from pack_policy_params"

    # Tile the batch axis; small batches use a single full-array block.
    tb = B if B <= tile_b else tile_b
    pb = _round_up(B, tb)
    x32 = jnp.asarray(x, jnp.float32)
    if pb != B:
        x32 = jnp.pad(x32, ((0, pb - B), (0, 0)))    # fused by XLA inside this jit

    kernel = functools.partial(
        _policy_kernel, n_in=n_in, n_hidden=n_hidden, n_out=n_out,
        off_b1=off_b1, off_w2=off_w2, off_b2=off_b2)

    out = pl.pallas_call(
        kernel,
        out_shape=jax.ShapeDtypeStruct((pb, n_out), jnp.float32),
        grid=(pb // tb,),
        in_specs=[
            pl.BlockSpec((tb, n_in), lambda i: (i, 0)),              # batch-tiled x
            pl.BlockSpec((total_rows, n_hidden), lambda i: (0, 0)),  # resident weight slab
        ],
        out_specs=pl.BlockSpec((tb, n_out), lambda i: (i, 0)),
        compiler_params=pltpu.CompilerParams(
            dimension_semantics=("parallel",)),      # shards across v7x's 2 TCs
    )(x32, packed_params)

    return out if pb == B else out[:B]


def _ref_forward(x, w1, b1, w2, b2):
    h = jnp.maximum(x @ w1.T + b1, 0.0)
    logits = h @ w2.T + b2
    return jax.nn.softmax(logits, axis=1)


def _init_linear(key, out_features, in_features):
    # Mimic PyTorch nn.Linear default init: U(-1/sqrt(fan_in), 1/sqrt(fan_in)).
    kw, kb = jax.random.split(key)
    bound = 1.0 / jnp.sqrt(jnp.float32(in_features))
    w = jax.random.uniform(kw, (out_features, in_features), jnp.float32,
                           minval=-bound, maxval=bound)
    b = jax.random.uniform(kb, (out_features,), jnp.float32,
                           minval=-bound, maxval=bound)
    return w, b


if __name__ == "__main__":
    # CartPole-style sizes: 4 observations -> 32 hidden -> 2 actions, batch 8.
    B, N_INPUT, N_HIDDEN, N_OUTPUT = 8, 4, 32, 2

    key = jax.random.PRNGKey(0)
    kx, k1, k2 = jax.random.split(key, 3)

    x = jax.random.normal(kx, (B, N_INPUT), jnp.float32)
    w1, b1 = _init_linear(k1, N_HIDDEN, N_INPUT)
    w2, b2 = _init_linear(k2, N_OUTPUT, N_HIDDEN)

    # One-time parameter packing (lives in the training state).
    params = pack_policy_params(w1, b1, w2, b2)
    params = jax.block_until_ready(params)

    out = policy_net_forward(x, params, n_out=N_OUTPUT, tile_b=128)
    out = jax.block_until_ready(out)

    ref = _ref_forward(x, w1, b1, w2, b2)
    assert out.shape == (B, N_OUTPUT)
    assert jnp.allclose(out, ref, atol=1e-5, rtol=1e-5), "mismatch vs JAX reference"
    assert jnp.allclose(jnp.sum(out, axis=1), 1.0, atol=1e-5), "rows must sum to 1"

    print("KERNEL_OK")
</pallas_src>

<mosaic_0001>
module attributes {stable_mosaic.version = 11 : i64} {
  func.func @_policy_kernel(%arg0: i32, %arg1: memref<8x4xf32, #tpu.memory_space<vmem>>, %arg2: memref<56x32xf32, #tpu.memory_space<vmem>>, %arg3: memref<8x2xf32, #tpu.memory_space<vmem>>) attributes {dimension_semantics = [#tpu.dimension_semantics<parallel>], iteration_bounds = array<i64: 1>, scalar_prefetch = 0 : i64, scratch_operands = 0 : i64, tpu.core_type = #tpu.core_type<tc>, window_params = [{transform_indices = @transform_0, window_bounds = array<i64: 8, 4>}, {pipeline_mode = #tpu.pipeline_mode<synchronous>, transform_indices = @transform_1, window_bounds = array<i64: 56, 32>}, {transform_indices = @transform_2, window_bounds = array<i64: 8, 2>}]} {
    %c0 = arith.constant 0 : index
    %c0_0 = arith.constant 0 : index
    %0 = vector.load %arg1[%c0, %c0_0] : memref<8x4xf32, #tpu.memory_space<vmem>>, vector<8x4xf32>
    %c0_1 = arith.constant 0 : index
    %c0_2 = arith.constant 0 : index
    %1 = vector.load %arg2[%c0_1, %c0_2] : memref<56x32xf32, #tpu.memory_space<vmem>>, vector<4x32xf32>
    %c8 = arith.constant 8 : index
    %c0_3 = arith.constant 0 : index
    %2 = vector.load %arg2[%c8, %c0_3] : memref<56x32xf32, #tpu.memory_space<vmem>>, vector<1x32xf32>
    %c16 = arith.constant 16 : index
    %c0_4 = arith.constant 0 : index
    %3 = vector.load %arg2[%c16, %c0_4] : memref<56x32xf32, #tpu.memory_space<vmem>>, vector<32x32xf32>
    %c48 = arith.constant 48 : index
    %c0_5 = arith.constant 0 : index
    %4 = vector.load %arg2[%c48, %c0_5] : memref<56x32xf32, #tpu.memory_space<vmem>>, vector<1x32xf32>
    %cst = arith.constant dense<0.000000e+00> : vector<8x32xf32>
    %5 = tpu.matmul %0, %1, %cst {dimension_numbers = #tpu.dot_dimension_numbers<[1], [0], [0], [1], [0, 0, 1, 1], [], []>} : vector<8x4xf32>, vector<4x32xf32>, vector<8x32xf32> -> vector<8x32xf32>
    %6 = vector.broadcast %2 : vector<1x32xf32> to vector<8x32xf32>
    %7 = arith.addf %5, %6 : vector<8x32xf32>
    %cst_6 = arith.constant 0.000000e+00 : f32
    %8 = vector.broadcast %cst_6 : f32 to vector<8x32xf32>
    %9 = arith.maximumf %7, %8 : vector<8x32xf32>
    %cst_7 = arith.constant dense<0.000000e+00> : vector<8x32xf32>
    %10 = tpu.matmul %9, %3, %cst_7 {dimension_numbers = #tpu.dot_dimension_numbers<[1], [0], [0], [1], [0, 0, 1, 1], [], []>} : vector<8x32xf32>, vector<32x32xf32>, vector<8x32xf32> -> vector<8x32xf32>
    %11 = vector.broadcast %4 : vector<1x32xf32> to vector<8x32xf32>
    %12 = arith.addf %10, %11 : vector<8x32xf32>
    %13 = vector.extract_strided_slice %12 {offsets = [0, 0], sizes = [8, 2], strides = [1, 1]} : vector<8x32xf32> to vector<8x2xf32>
    %cst_8 = arith.constant dense<0xFF800000> : vector<8xf32>
    %14 = vector.multi_reduction <maximumf>, %13, %cst_8 [1] : vector<8x2xf32> to vector<8xf32>
    %15 = vector.shape_cast %14 : vector<8xf32> to vector<8x1xf32>
    %16 = vector.broadcast %15 : vector<8x1xf32> to vector<8x2xf32>
    %17 = arith.subf %13, %16 : vector<8x2xf32>
    %18 = math.exp %17 : vector<8x2xf32>
    %cst_9 = arith.constant dense<0.000000e+00> : vector<8xf32>
    %19 = vector.multi_reduction <add>, %18, %cst_9 [1] : vector<8x2xf32> to vector<8xf32>
    %20 = vector.shape_cast %19 : vector<8xf32> to vector<8x1xf32>
    %21 = tpu.reciprocal %20 : vector<8x1xf32> -> vector<8x1xf32>
    %22 = vector.broadcast %21 : vector<8x1xf32> to vector<8x2xf32>
    %23 = arith.mulf %18, %22 : vector<8x2xf32>
    %c0_10 = arith.constant 0 : index
    %c0_11 = arith.constant 0 : index
    %24 = vector.load %arg3[%c0_10, %c0_11] : memref<8x2xf32, #tpu.memory_space<vmem>>, vector<8x2xf32>
    tpu.vector_store %arg3[%c0_10, %c0_11], %23 {strides = array<i32>} : memref<8x2xf32, #tpu.memory_space<vmem>>, vector<8x2xf32>,
    return
  }
  func.func @transform_0(%arg0: i32) -> (i32, i32) {
    %c0_i32 = arith.constant 0 : i32
    %c0_i32_0 = arith.constant 0 : i32
    return %arg0, %c0_i32 : i32, i32
  }
  func.func @transform_1(%arg0: i32) -> (i32, i32) {
    %c0_i32 = arith.constant 0 : i32
    %c0_i32_0 = arith.constant 0 : i32
    %c0_i32_1 = arith.constant 0 : i32
    return %c0_i32, %c0_i32_0 : i32, i32
  }
  func.func @transform_2(%arg0: i32) -> (i32, i32) {
    %c0_i32 = arith.constant 0 : i32
    %c0_i32_0 = arith.constant 0 : i32
    return %arg0, %c0_i32 : i32, i32
  }
}

</mosaic_0001>

<bundles_post_ra>
// kernel: policy_net_forward.1
= control target key start
LH: loop header
LB: loop body
LE: loop exit
PB: predicated region body
PF: predicated region fallthrough
CT: control target
= control target key end

     0   :  { %vm27_vm0 = vcmask 1043456   ;;  %vm23_vm1 = vcmask 31744   ;;  %v238_v0 = vmov 0.0   ;;  %vm239_vm2 = vmmov 0   ;;  %s286_s1 = inlined_call_operand.vmem [shape: f32[56,32], index: 1, kind: input, shape index: {}]   ;;  %s287_s0 = inlined_call_operand.vmem [shape: f32[8,4], index: 0, kind: input, shape index: {}]   ;;  %s288_s2 = inlined_call_operand.vmem [shape: f32[8,2], index: 2, kind: output, shape index: {}]  }
   0x1   :  { %209 = vmatprep.subr.mxu0 %v238_v0  ;;  %v12_v1 = vld [vmem:[%s286_s1] sm:$0xf]  ;;  %211 = vmatprep.mubr.msk.f32.mxu0 %vm239_vm2, %v238_v0  ;;  %v14_v3 = vld [vmem:[%s286_s1 + $0x10] sm:$0xff]  ;;  %v240_v4 = vmov 0.0|0.0   ;;  %v15_v5 = vld [vmem:[%s286_s1 + $0x18] sm:$0xff]  ;;  %vm106_vm3 = vcmask 261120  }
   0x2   :  { %v11_v2 = vld [vmem:[%s287_s0] sm:$0xff]  ;;  %210 = vmatpush3.msk.msra.mxu0 %vm27_vm0, %v12_v1  ;;  %225 = vmatprep.subr.bf16.mxu1 %v240_v4  ;;  %v226_v6 = vpack.c.bf16 %v15_v5, %v14_v3  ;;  %v17_v8 = vld [vmem:[%s286_s1 + $0x28] sm:$0xff]  ;;  %v200_v15 = vld [vmem:[%s286_s1 + $0x30] ss:$0 sm:$0xff]  ;;  %vm180_vm4 = vcmask 15360  }
   0x3   :  { %212 = vmatmul.mubr.msk.f32.vlgmr.msra.gmra.mrb[0].mxu0 %vm23_vm1, %v11_v2  ;;  %222 = vmatprep.mubr.msk.f32.mxu1 %vm239_vm2, %v238_v0  ;;  %v16_v7 = vld [vmem:[%s286_s1 + $0x20] sm:$0xff]  ;;  %v197_v10 = vld [vmem:[%s286_s1 + $0x8] ss:$0 sm:$0xff] }
   0x4   :  { %227 = vmatpush3.bf16.msra.mxu1 %v226_v6  ;;  %v229_v9 = vpack.c.bf16 %v17_v8, %v16_v7 }
   0x5   :  { %228 = vmatprep.subr.bf16.mxu1 %v240_v4 }
   0x8   :  { %230 = vmatpush3.bf16.msra.mxu1 %v229_v9 }
  0xd6   :  { %v97_v11 = vpop.f32.mrb[0].mxu0 }
  0xd7   :  { %v98_v12 = vadd.f32 %v197_v10, %v97_v11  ;;  %v213_v13 = vpop.f32.mrb[1].mxu0 }
  0xd9   :  { %v101_v14 = vmax.f32 %v98_v12, 0.0 }
  0xdb   :  { %223 = vmatmul.mubr.msk.f32.vlgmr.msra.gmra.mrb[0].mxu1 %vm106_vm3, %v101_v14 }
 0x1ae   :  { %v176_v16 = vpop.f32.mrb[0].mxu1 }
 0x1af   :  { %v177_v17 = vadd.f32 %v200_v15, %v176_v16  ;;  %v224_v18 = vpop.f32.mrb[1].mxu1 }
 0x1b1   :  { %v181_v19 = vsel %vm180_vm4, %v177_v17, -inf }
 0x1b2   :  { %182 = vmax.xlane.f32.xlu0 %v181_v19 }
 0x23f   :  { %v183_v20 = vpop.xlane.xlu0 %182 }
 0x240   :  { %v184_v21 = vsub.f32 %v177_v17, %v183_v20 }
 0x242   :  { %v185_v22 = vmul.f32 1.442695, %v184_v21 }
 0x244   :  { %234 = vpow2.f32 %v185_v22 }
 0x24e   :  { %v235_v23 = vpop.eup %234 }
 0x24f   :  { %v187_v24 = vsel %vm180_vm4, %v235_v23, 0.0 }
 0x250   :  { %188 = vadd.xlane.f32.xlu0 %v187_v24 }
 0x2dd   :  { %v189_v25 = vpop.xlane.xlu0 %188 }
 0x2de   :  { %236 = vrcp.f32 %v189_v25 }
 0x2e8   :  { %v237_v26 = vpop.eup %236 }
 0x2e9   :  { %v191_v27 = vmul.f32 %v237_v26, %v235_v23 }
 0x2eb   :  { %192 = vst.msk [vmem:[%s288_s2] sm:$0xff] %vm180_vm4, %v191_v27 }

</bundles_post_ra>
